<compile_context>
chip_gen: v6e
topology: v6e:2x2x1
jax: 0.10.0
libtpu: 0.0.40
codegen_flags: <defaults>
</compile_context>

<pallas_src>
from functools import partial

import jax
import jax.numpy as jnp
from jax.experimental import pallas as pl
from jax.experimental.pallas import tpu as pltpu


def spa_kernel(hm_ref, sm_ref, x_ref, wqkv_ref, wout_ref, bout_ref, o_ref,
               *, heads, dim_head, scale, compute_dtype):
    bt, n, d = x_ref.shape
    inner = heads * dim_head
    cdt = compute_dtype

    # ---- flattened QKV projection: one (bt*n, d) @ (d, 3*inner) MXU matmul ----
    xf = x_ref[...].reshape(bt * n, d).astype(cdt)
    qkv = jnp.dot(xf, wqkv_ref[...].astype(cdt),
                  preferred_element_type=jnp.float32)          # (bt*n, 3*inner) f32

    # 128-lane-aligned q/k/v splits; the (bt*n, inner) -> (bt, n, inner) reshape
    # is layout-trivial because n == 8 matches the sublane tile height.
    q = qkv[:, :inner].reshape(bt, n, inner)
    k = qkv[:, inner:2 * inner].reshape(bt, n, inner)
    v = qkv[:, 2 * inner:].reshape(bt, n, inner)

    hm = hm_ref[...]                                           # (heads*n, inner) 0/1 head-block mask
    sm = sm_ref[...]                                           # (heads*n, n) additive SPA mask

    # Replicate q into `heads` row blocks (tile-aligned concat) and keep only
    # each head's own feature columns; one batched matmul then produces every
    # per-head (n, n) score block at once -- no per-head loop, no tiny dots.
    q_rep = jnp.concatenate([q] * heads, axis=1)               # (bt, heads*n, inner)
    q_t = (q_rep * hm[None]).astype(cdt)
    sim = jnp.einsum('bqc,bjc->bqj', q_t, k.astype(cdt),
                     preferred_element_type=jnp.float32)       # (bt, heads*n, n)

    # ExcelFormer semi-permeable mask is added BEFORE scaling (matches PyTorch).
    logits = (sim + sm[None]) * scale
    logits = logits - jnp.max(logits, axis=-1, keepdims=True)
    p = jnp.exp(logits)
    denom = jnp.sum(p, axis=-1, keepdims=True)
    p = p * pl.reciprocal(denom, approx=True)                  # EUP slot, off the VALU path

    # Attention output for all heads, stacked along rows.
    out_t = jnp.einsum('bqj,bjc->bqc', p.astype(cdt), v.astype(cdt),
                       preferred_element_type=jnp.float32)     # (bt, heads*n, inner)
    out_t = out_t * hm[None]                                   # keep each head's own columns

    # Head-block row reduction: row block h holds head h's output restricted to
    # its own 16 columns, so summing the blocks re-assembles (bt, n, inner).
    # Static sublane-aligned slices + vector adds only.
    out_inner = out_t[:, :n, :]
    for h in range(1, heads):
        out_inner = out_inner + out_t[:, h * n:(h + 1) * n, :]

    # ---- flattened output projection with bias ----
    out = jnp.dot(out_inner.reshape(bt * n, inner).astype(cdt),
                  wout_ref[...].astype(cdt),
                  preferred_element_type=jnp.float32) + bout_ref[...]
    o_ref[...] = out.reshape(bt, n, d).astype(o_ref.dtype)


def semi_permeable_attention(x, w_qkv, w_out, b_out, *, heads, dim_head,
                             block_b=128, compute_dtype=jnp.bfloat16):
    B, N, D = x.shape
    inner = heads * dim_head
    assert w_qkv.shape == (D, 3 * inner)
    assert w_out.shape == (inner, D)
    assert b_out.shape == (1, D)
    scale = dim_head ** (-0.5)

    # Fold many batch elements into each grid step; amortizes the ~0.35us/step
    # overhead and keeps DMAs large & contiguous.
    num_blocks = pl.cdiv(B, block_b)
    if num_blocks > 1 and num_blocks % 2:
        num_blocks += 1          # v7x has 2 TensorCores: keep the parallel grid even
    bt = block_b if num_blocks > 1 else B
    b_pad = bt * num_blocks
    if b_pad != B:
        x = jnp.pad(x, ((0, b_pad - B), (0, 0), (0, 0)))   # padded rows sliced off below

    # Masks are identical for every batch element and grid step: build them once
    # here and pass them through constant-index BlockSpecs (hoisted from the body).
    ids = jnp.arange(N)
    allowed = (ids[None, :] <= ids[:, None]).astype(jnp.float32)      # j <= i
    spa_mask = jnp.tile((1.0 - allowed) * -10000.0, (heads, 1))       # (heads*N, N)
    row_head = jnp.repeat(jnp.arange(heads), N)                       # (heads*N,)
    col_head = jnp.arange(inner) // dim_head                          # (inner,)
    head_mask = (row_head[:, None] == col_head[None, :]).astype(jnp.float32)

    kernel = partial(spa_kernel, heads=heads, dim_head=dim_head, scale=scale,
                     compute_dtype=compute_dtype)
    const = lambda b: (0, 0)   # replicated operands: constant block index, fetched once
    # NOTE: these replicated operands could also be single-buffered
    # (pipeline_mode=pl.Buffered(1)); left default to keep the pipeline simple.

    out = pl.pallas_call(
        kernel,
        out_shape=jax.ShapeDtypeStruct((b_pad, N, D), x.dtype),
        grid=(num_blocks,),
        in_specs=[
            pl.BlockSpec((heads * N, inner), const),          # head-block mask
            pl.BlockSpec((heads * N, N), const),              # semi-permeable mask
            pl.BlockSpec((bt, N, D), lambda b: (b, 0, 0)),    # x: Bt samples / step
            pl.BlockSpec((D, 3 * inner), const),              # W_qkv
            pl.BlockSpec((inner, D), const),                  # W_out
            pl.BlockSpec((1, D), const),                      # b_out
        ],
        out_specs=pl.BlockSpec((bt, N, D), lambda b: (b, 0, 0)),
        compiler_params=pltpu.CompilerParams(
            dimension_semantics=("parallel",),
            # v7x: 64 MiB VMEM (32 MiB scoped default). block_b=128 keeps the
            # double-buffered tiles + in-kernel intermediates far below this.
            vmem_limit_bytes=32 * 1024 * 1024,
        ),
    )(head_mask, spa_mask, x, w_qkv, w_out, b_out)
    return out[:B]


def reference_forward(x, w_qkv, w_out, b_out, *, heads, dim_head):
    """Pure-JAX reference mirroring the PyTorch module exactly."""
    B, N, D = x.shape
    inner = heads * dim_head
    scale = dim_head ** (-0.5)
    qkv = x @ w_qkv
    q, k, v = jnp.split(qkv, 3, axis=-1)

    def rearrange(t):
        return t.reshape(B, N, heads, dim_head).transpose(0, 2, 1, 3)

    q, k, v = rearrange(q), rearrange(k), rearrange(v)
    sim = jnp.einsum('bhid,bhjd->bhij', q, k)
    ids = jnp.arange(N)
    allowed = (ids[None, :] <= ids[:, None]).astype(jnp.float32)
    mask = (1.0 - allowed) * -10000.0
    attn = jax.nn.softmax((sim + mask) * scale, axis=-1)
    out = jnp.einsum('bhij,bhjd->bhid', attn, v)
    out = out.transpose(0, 2, 1, 3).reshape(B, N, inner)
    return out @ w_out + b_out


if __name__ == "__main__":
    # Shapes consistent with the module: num_cols=8, dim=32, heads=8, dim_head=16.
    B, N, D = 4, 8, 32
    heads, dim_head = 8, 16
    inner = heads * dim_head

    key = jax.random.PRNGKey(0)
    kx, kq, kw, kb, kx2 = jax.random.split(key, 5)

    x = jax.random.normal(kx, (B, N, D), dtype=jnp.float32)
    w_qkv = jax.random.normal(kq, (D, 3 * inner), dtype=jnp.float32) * (D ** -0.5)
    w_out = jax.random.normal(kw, (inner, D), dtype=jnp.float32) * (inner ** -0.5)
    b_out = jax.random.normal(kb, (1, D), dtype=jnp.float32) * 0.01

    ref = reference_forward(x, w_qkv, w_out, b_out, heads=heads, dim_head=dim_head)

    # 1) f32 compute path, single batch block.
    out = semi_permeable_attention(x, w_qkv, w_out, b_out, heads=heads,
                                   dim_head=dim_head, compute_dtype=jnp.float32)
    out = jax.block_until_ready(out)
    assert out.shape == (B, N, D)
    assert jnp.allclose(out, ref, atol=1e-2, rtol=1e-2), "f32 kernel mismatch vs reference"

    # 2) bf16-MXU path; small block_b forces a multi-block grid with batch padding
    #    and the even-grid (megacore) rounding path.
    B2 = 5
    x2 = jax.random.normal(kx2, (B2, N, D), dtype=jnp.float32)
    ref2 = reference_forward(x2, w_qkv, w_out, b_out, heads=heads, dim_head=dim_head)
    out2 = semi_permeable_attention(x2, w_qkv, w_out, b_out, heads=heads,
                                    dim_head=dim_head, block_b=2,
                                    compute_dtype=jnp.bfloat16)
    out2 = jax.block_until_ready(out2)
    assert out2.shape == (B2, N, D)
    assert jnp.allclose(out2, ref2, atol=5e-2, rtol=5e-2), "bf16 kernel mismatch vs reference"

    print("KERNEL_OK")
</pallas_src>

<mosaic_0001>
module attributes {stable_mosaic.version = 11 : i64} {
  func.func @spa_kernel(%arg0: i32, %arg1: memref<64x128xf32, #tpu.memory_space<vmem>>, %arg2: memref<64x8xf32, #tpu.memory_space<vmem>>, %arg3: memref<4x8x32xf32, #tpu.memory_space<vmem>>, %arg4: memref<32x384xf32, #tpu.memory_space<vmem>>, %arg5: memref<128x32xf32, #tpu.memory_space<vmem>>, %arg6: memref<1x32xf32, #tpu.memory_space<vmem>>, %arg7: memref<4x8x32xf32, #tpu.memory_space<vmem>>) attributes {dimension_semantics = [#tpu.dimension_semantics<parallel>], iteration_bounds = array<i64: 1>, scalar_prefetch = 0 : i64, scratch_operands = 0 : i64, tpu.core_type = #tpu.core_type<tc>, window_params = [{pipeline_mode = #tpu.pipeline_mode<synchronous>, transform_indices = @transform_0, window_bounds = array<i64: 64, 128>}, {pipeline_mode = #tpu.pipeline_mode<synchronous>, transform_indices = @transform_1, window_bounds = array<i64: 64, 8>}, {transform_indices = @transform_2, window_bounds = array<i64: 4, 8, 32>}, {pipeline_mode = #tpu.pipeline_mode<synchronous>, transform_indices = @transform_3, window_bounds = array<i64: 32, 384>}, {pipeline_mode = #tpu.pipeline_mode<synchronous>, transform_indices = @transform_4, window_bounds = array<i64: 128, 32>}, {pipeline_mode = #tpu.pipeline_mode<synchronous>, transform_indices = @transform_5, window_bounds = array<i64: 1, 32>}, {transform_indices = @transform_6, window_bounds = array<i64: 4, 8, 32>}]} {
    %c0 = arith.constant 0 : index
    %c0_0 = arith.constant 0 : index
    %c0_1 = arith.constant 0 : index
    %0 = vector.load %arg3[%c0, %c0_0, %c0_1] : memref<4x8x32xf32, #tpu.memory_space<vmem>>, vector<4x8x32xf32>
    %1 = vector.shape_cast %0 : vector<4x8x32xf32> to vector<32x32xf32>
    %c0_2 = arith.constant 0 : index
    %c0_3 = arith.constant 0 : index
    %2 = vector.load %arg4[%c0_2, %c0_3] : memref<32x384xf32, #tpu.memory_space<vmem>>, vector<32x384xf32>
    %cst = arith.constant dense<0.000000e+00> : vector<32x384xf32>
    %3 = tpu.matmul %1, %2, %cst {dimension_numbers = #tpu.dot_dimension_numbers<[1], [0], [0], [1], [0, 0, 1, 1], [], []>} : vector<32x32xf32>, vector<32x384xf32>, vector<32x384xf32> -> vector<32x384xf32>
    %4 = vector.extract_strided_slice %3 {offsets = [0, 0], sizes = [32, 128], strides = [1, 1]} : vector<32x384xf32> to vector<32x128xf32>
    %5 = vector.shape_cast %4 : vector<32x128xf32> to vector<4x8x128xf32>
    %6 = vector.extract_strided_slice %3 {offsets = [0, 128], sizes = [32, 128], strides = [1, 1]} : vector<32x384xf32> to vector<32x128xf32>
    %7 = vector.shape_cast %6 : vector<32x128xf32> to vector<4x8x128xf32>
    %8 = vector.extract_strided_slice %3 {offsets = [0, 256], sizes = [32, 128], strides = [1, 1]} : vector<32x384xf32> to vector<32x128xf32>
    %9 = vector.shape_cast %8 : vector<32x128xf32> to vector<4x8x128xf32>
    %c0_4 = arith.constant 0 : index
    %c0_5 = arith.constant 0 : index
    %10 = vector.load %arg1[%c0_4, %c0_5] : memref<64x128xf32, #tpu.memory_space<vmem>>, vector<64x128xf32>
    %c0_6 = arith.constant 0 : index
    %c0_7 = arith.constant 0 : index
    %11 = vector.load %arg2[%c0_6, %c0_7] : memref<64x8xf32, #tpu.memory_space<vmem>>, vector<64x8xf32>
    %12 = tpu.concatenate %5, %5, %5, %5, %5, %5, %5, %5 in 1 : vector<4x8x128xf32>, vector<4x8x128xf32>, vector<4x8x128xf32>, vector<4x8x128xf32>, vector<4x8x128xf32>, vector<4x8x128xf32>, vector<4x8x128xf32>, vector<4x8x128xf32> -> vector<4x64x128xf32>
    %13 = vector.shape_cast %10 : vector<64x128xf32> to vector<1x64x128xf32>
    %14 = vector.broadcast %13 : vector<1x64x128xf32> to vector<4x64x128xf32>
    %15 = arith.mulf %12, %14 : vector<4x64x128xf32>
    "tpu.trace_start"() <{level = 10 : i32, message = "bqc,bjc->bqj"}> : () -> ()
    %cst_8 = arith.constant dense<0.000000e+00> : vector<4x64x8xf32>
    %16 = tpu.matmul %15, %7, %cst_8 {dimension_numbers = #tpu.dot_dimension_numbers<[2], [2], [1], [1], [0, 0, 0, 1, 1, 1], [0], [0]>} : vector<4x64x128xf32>, vector<4x8x128xf32>, vector<4x64x8xf32> -> vector<4x64x8xf32>
    "tpu.trace_stop"() : () -> ()
    %17 = vector.shape_cast %11 : vector<64x8xf32> to vector<1x64x8xf32>
    %18 = vector.broadcast %17 : vector<1x64x8xf32> to vector<4x64x8xf32>
    %19 = arith.addf %16, %18 : vector<4x64x8xf32>
    %cst_9 = arith.constant 2.500000e-01 : f32
    %20 = vector.broadcast %cst_9 : f32 to vector<4x64x8xf32>
    %21 = arith.mulf %19, %20 : vector<4x64x8xf32>
    %cst_10 = arith.constant dense<0xFF800000> : vector<4x64xf32>
    %22 = vector.multi_reduction <maximumf>, %21, %cst_10 [2] : vector<4x64x8xf32> to vector<4x64xf32>
    %23 = vector.shape_cast %22 : vector<4x64xf32> to vector<4x64x1xf32>
    %24 = vector.broadcast %23 : vector<4x64x1xf32> to vector<4x64x8xf32>
    %25 = arith.subf %21, %24 : vector<4x64x8xf32>
    %26 = math.exp %25 : vector<4x64x8xf32>
    %cst_11 = arith.constant dense<0.000000e+00> : vector<4x64xf32>
    %27 = vector.multi_reduction <add>, %26, %cst_11 [2] : vector<4x64x8xf32> to vector<4x64xf32>
    %28 = vector.shape_cast %27 : vector<4x64xf32> to vector<4x64x1xf32>
    %29 = tpu.reciprocal %28 {approx = true} : vector<4x64x1xf32> -> vector<4x64x1xf32>
    %30 = vector.broadcast %29 : vector<4x64x1xf32> to vector<4x64x8xf32>
    %31 = arith.mulf %26, %30 : vector<4x64x8xf32>
    "tpu.trace_start"() <{level = 10 : i32, message = "bqj,bjc->bqc"}> : () -> ()
    %cst_12 = arith.constant dense<0.000000e+00> : vector<4x64x128xf32>
    %32 = tpu.matmul %31, %9, %cst_12 {dimension_numbers = #tpu.dot_dimension_numbers<[2], [1], [1], [2], [0, 0, 0, 1, 1, 2], [0], [0]>} : vector<4x64x8xf32>, vector<4x8x128xf32>, vector<4x64x128xf32> -> vector<4x64x128xf32>
    "tpu.trace_stop"() : () -> ()
    %33 = vector.shape_cast %10 : vector<64x128xf32> to vector<1x64x128xf32>
    %34 = vector.broadcast %33 : vector<1x64x128xf32> to vector<4x64x128xf32>
    %35 = arith.mulf %32, %34 : vector<4x64x128xf32>
    %36 = vector.extract_strided_slice %35 {offsets = [0, 0, 0], sizes = [4, 8, 128], strides = [1, 1, 1]} : vector<4x64x128xf32> to vector<4x8x128xf32>
    %37 = vector.extract_strided_slice %35 {offsets = [0, 8, 0], sizes = [4, 8, 128], strides = [1, 1, 1]} : vector<4x64x128xf32> to vector<4x8x128xf32>
    %38 = arith.addf %36, %37 : vector<4x8x128xf32>
    %39 = vector.extract_strided_slice %35 {offsets = [0, 16, 0], sizes = [4, 8, 128], strides = [1, 1, 1]} : vector<4x64x128xf32> to vector<4x8x128xf32>
    %40 = arith.addf %38, %39 : vector<4x8x128xf32>
    %41 = vector.extract_strided_slice %35 {offsets = [0, 24, 0], sizes = [4, 8, 128], strides = [1, 1, 1]} : vector<4x64x128xf32> to vector<4x8x128xf32>
    %42 = arith.addf %40, %41 : vector<4x8x128xf32>
    %43 = vector.extract_strided_slice %35 {offsets = [0, 32, 0], sizes = [4, 8, 128], strides = [1, 1, 1]} : vector<4x64x128xf32> to vector<4x8x128xf32>
    %44 = arith.addf %42, %43 : vector<4x8x128xf32>
    %45 = vector.extract_strided_slice %35 {offsets = [0, 40, 0], sizes = [4, 8, 128], strides = [1, 1, 1]} : vector<4x64x128xf32> to vector<4x8x128xf32>
    %46 = arith.addf %44, %45 : vector<4x8x128xf32>
    %47 = vector.extract_strided_slice %35 {offsets = [0, 48, 0], sizes = [4, 8, 128], strides = [1, 1, 1]} : vector<4x64x128xf32> to vector<4x8x128xf32>
    %48 = arith.addf %46, %47 : vector<4x8x128xf32>
    %49 = vector.extract_strided_slice %35 {offsets = [0, 56, 0], sizes = [4, 8, 128], strides = [1, 1, 1]} : vector<4x64x128xf32> to vector<4x8x128xf32>
    %50 = arith.addf %48, %49 : vector<4x8x128xf32>
    %51 = vector.shape_cast %50 : vector<4x8x128xf32> to vector<32x128xf32>
    %c0_13 = arith.constant 0 : index
    %c0_14 = arith.constant 0 : index
    %52 = vector.load %arg5[%c0_13, %c0_14] : memref<128x32xf32, #tpu.memory_space<vmem>>, vector<128x32xf32>
    %cst_15 = arith.constant dense<0.000000e+00> : vector<32x32xf32>
    %53 = tpu.matmul %51, %52, %cst_15 {dimension_numbers = #tpu.dot_dimension_numbers<[1], [0], [0], [1], [0, 0, 1, 1], [], []>} : vector<32x128xf32>, vector<128x32xf32>, vector<32x32xf32> -> vector<32x32xf32>
    %c0_16 = arith.constant 0 : index
    %c0_17 = arith.constant 0 : index
    %54 = vector.load %arg6[%c0_16, %c0_17] : memref<1x32xf32, #tpu.memory_space<vmem>>, vector<1x32xf32>
    %55 = vector.broadcast %54 : vector<1x32xf32> to vector<32x32xf32>
    %56 = arith.addf %53, %55 : vector<32x32xf32>
    %57 = vector.shape_cast %56 : vector<32x32xf32> to vector<4x8x32xf32>
    %c0_18 = arith.constant 0 : index
    %c0_19 = arith.constant 0 : index
    %c0_20 = arith.constant 0 : index
    %58 = vector.load %arg7[%c0_18, %c0_19, %c0_20] : memref<4x8x32xf32, #tpu.memory_space<vmem>>, vector<4x8x32xf32>
    tpu.vector_store %arg7[%c0_18, %c0_19, %c0_20], %57 {strides = array<i32>} : memref<4x8x32xf32, #tpu.memory_space<vmem>>, vector<4x8x32xf32>,
    return
  }
  func.func @transform_0(%arg0: i32) -> (i32, i32) {
    %c0_i32 = arith.constant 0 : i32
    %c0_i32_0 = arith.constant 0 : i32
    %c0_i32_1 = arith.constant 0 : i32
    return %c0_i32, %c0_i32_0 : i32, i32
  }
  func.func @transform_1(%arg0: i32) -> (i32, i32) {
    %c0_i32 = arith.constant 0 : i32
    %c0_i32_0 = arith.constant 0 : i32
    %c0_i32_1 = arith.constant 0 : i32
    return %c0_i32, %c0_i32_0 : i32, i32
  }
  func.func @transform_2(%arg0: i32) -> (i32, i32, i32) {
    %c0_i32 = arith.constant 0 : i32
    %c0_i32_0 = arith.constant 0 : i32
    %c0_i32_1 = arith.constant 0 : i32
    return %arg0, %c0_i32, %c0_i32_0 : i32, i32, i32
  }
  func.func @transform_3(%arg0: i32) -> (i32, i32) {
    %c0_i32 = arith.constant 0 : i32
    %c0_i32_0 = arith.constant 0 : i32
    %c0_i32_1 = arith.constant 0 : i32
    return %c0_i32, %c0_i32_0 : i32, i32
  }
  func.func @transform_4(%arg0: i32) -> (i32, i32) {
    %c0_i32 = arith.constant 0 : i32
    %c0_i32_0 = arith.constant 0 : i32
    %c0_i32_1 = arith.constant 0 : i32
    return %c0_i32, %c0_i32_0 : i32, i32
  }
  func.func @transform_5(%arg0: i32) -> (i32, i32) {
    %c0_i32 = arith.constant 0 : i32
    %c0_i32_0 = arith.constant 0 : i32
    %c0_i32_1 = arith.constant 0 : i32
    return %c0_i32, %c0_i32_0 : i32, i32
  }
  func.func @transform_6(%arg0: i32) -> (i32, i32, i32) {
    %c0_i32 = arith.constant 0 : i32
    %c0_i32_0 = arith.constant 0 : i32
    %c0_i32_1 = arith.constant 0 : i32
    return %arg0, %c0_i32, %c0_i32_0 : i32, i32, i32
  }
}

</mosaic_0001>

<bundles_post_ra>
// kernel: tpu_custom_call.1
= control target key start
LH: loop header
LB: loop body
LE: loop exit
PB: predicated region body
PF: predicated region fallthrough
CT: control target
= control target key end

     0   :  { %v2251_v4 = vmov 0.0   ;;  %s2884_s0 = inlined_call_operand.vmem [shape: f32[64,128], index: 0, kind: input, shape index: {}]   ;;  %s2885_s1 = inlined_call_operand.vmem [shape: f32[64,8], index: 1, kind: input, shape index: {}]   ;;  %s2886_s2 = inlined_call_operand.vmem [shape: f32[4,8,32], index: 2, kind: input, shape index: {}]   ;;  %s2887_s3 = inlined_call_operand.vmem [shape: f32[32,384], index: 3, kind: input, shape index: {}]   ;;  %s2888_s4 = inlined_call_operand.vmem [shape: f32[128,32], index: 4, kind: input, shape index: {}]   ;;  %s2889_s5 = inlined_call_operand.vmem [shape: f32[1,32], index: 5, kind: input, shape index: {}]   ;;  %s2890_s6 = inlined_call_operand.hbm [shape: f32[4,8,32], index: 6, kind: output, shape index: {}]  }
   0x1   :  { %v38_v0 = vld [vmem:[%s2887_s3 + $0x50] sm:$0xff]  ;;  %v37_v1 = vld [vmem:[%s2887_s3 + $0x48] sm:$0xff]  ;;  %v35_v2 = vld [vmem:[%s2887_s3 + $0x38] sm:$0xff]  ;;  %117 = vmatprep.mubr.f32.mxu0 %v2251_v4 }
   0x2   :  { %77 = vmatprep.subr.mxu0 %v38_v0  ;;  %v34_v3 = vld [vmem:[%s2887_s3 + $0x30] sm:$0xff]  ;;  %v32_v5 = vld [vmem:[%s2887_s3 + $0x20] sm:$0xff]  ;;  %v31_v6 = vld [vmem:[%s2887_s3 + $0x18] sm:$0xff] }
   0x3   :  { %78 = vmatpush1.msra.mxu0 %v37_v1  ;;  %v29_v7 = vld [vmem:[%s2887_s3 + $0x8] sm:$0xff]  ;;  %v28_v8 = vld [vmem:[%s2887_s3] sm:$0xff] }
   0x4   :  { %79 = vmatprep.subr.mxu0 %v35_v2 }
   0x5   :  { %80 = vmatpush1.msra.mxu0 %v34_v3 }
   0x6   :  { %81 = vmatprep.subr.mxu0 %v32_v5 }
   0x7   :  { %11 = vsyncpa [#allocation3], 0  ;;  %82 = vmatpush1.msra.mxu0 %v31_v6  ;;  %v24_v9 = vld [vmem:[%s2886_s2] sm:$0xff]  ;;  %vm40_vm0 = vcmask 261120   ;;  %v39_v10 = vld [vmem:[%s2887_s3 + $0x58] sm:$0xff]  ;;  %vm727_vm1 = vcmask 64512  }
   0x8   :  { %83 = vmatprep.subr.mxu0 %v29_v7  ;;  %v36_v11 = vld [vmem:[%s2887_s3 + $0x40] sm:$0xff]  ;;  %v25_v12 = vld [vmem:[%s2886_s2 + $0x8] sm:$0xff]  ;;  %v26_v14 = vld [vmem:[%s2886_s2 + $0x10] sm:$0xff]  ;;  %s2252_s29 = smov [#allocation2]  }
   0x9   :  { %84 = vmatpush1.msra.mxu0 %v28_v8  ;;  %v33_v13 = vld [vmem:[%s2887_s3 + $0x28] sm:$0xff]  ;;  %v27_v15 = vld [vmem:[%s2886_s2 + $0x18] sm:$0xff]  ;;  %v30_v16 = vld [vmem:[%s2887_s3 + $0x10] sm:$0xff]  ;;  %s1773_s30 = sshll.u32 %s2252_s29, 4  ;;  %s1774_s30 = int_to_ptr.vmem [resolvable:$true] %s1773_s30 }
   0xa   :  { %1784 = vmatmul.mubr.msk.f32.vlgmr.msra.gmra.mxu0 %vm40_vm0, %v24_v9  ;;  %1925 = vmatprep.subr.mxu0 %v39_v10  ;;  %v227_v17 = vld [vmem:[%s2884_s0] sm:$0xff]  ;;  %v228_v21 = vld [vmem:[%s2884_s0 + $0x8] sm:$0xff]  ;;  %v229_v22 = vld [vmem:[%s2884_s0 + $0x10] sm:$0xff]  ;;  %p2234_p1 = scmp.lt.s32.totalorder %s1774_s30, %s1774_s30 }
   0xb   :  { %123 = vmatprep.mubr.f32.mxu0 %v2251_v4  ;;  %1926 = vmatpush3.msra.mxu0 %v39_v10  ;;  %v230_v28 = vld [vmem:[%s2884_s0 + $0x18] sm:$0xff]  ;;  %v231_v29 = vld [vmem:[%s2884_s0 + $0x20] sm:$0xff]  ;;  %v232_v34 = vld [vmem:[%s2884_s0 + $0x28] sm:$0xff] }
   0xc   :  { %1927 = vmatprep.subr.mxu0 %v36_v11  ;;  %v233_v37 = vld [vmem:[%s2884_s0 + $0x30] sm:$0xff]  ;;  %v234_v42 = vld [vmem:[%s2884_s0 + $0x38] sm:$0xff]  ;;  %v2379_v5 = vld [vmem:[%s2885_s1 + $0x8] sm:$0xff] }
   0xd   :  { %1928 = vmatpush3.msra.mxu0 %v36_v11  ;;  %v2384_v7 = vld [vmem:[%s2885_s1] sm:$0xff] }
   0xe   :  { %1785 = vmatmul.mubr.msk.f32.gmra.mxu0 %vm40_vm0, %v25_v12  ;;  %1929 = vmatprep.subr.mxu0 %v33_v13 }
   0xf   :  { %129 = vmatprep.mubr.f32.mxu0 %v2251_v4  ;;  %1930 = vmatpush3.msra.mxu0 %v33_v13 }
  0x10   :  { %1931 = vmatprep.subr.mxu0 %v30_v16 }
  0x11   :  { %1932 = vmatpush3.msra.mxu0 %v30_v16 }
  0x12   :  { %1786 = vmatmul.mubr.msk.f32.gmra.mxu0 %vm40_vm0, %v26_v14 }
  0x13   :  { %135 = vmatprep.mubr.f32.mxu0 %v2251_v4 }
  0x16   :  { %1787 = vmatmul.mubr.msk.f32.gmra.mxu0 %vm40_vm0, %v27_v15 }
  0x17   :  { %1933 = vmatprep.mubr.msk.f32.mxu0 %vm40_vm0, %v24_v9 }
  0x1a   :  { %1934 = vmatmul.mubr.msk.f32.vlgmr.msra.gmra.mxu0 %vm40_vm0, %v25_v12  ;;  %v2393_v12 = vld [vmem:[%s2885_s1 + $0x18] sm:$0xff] }
  0x1b   :  { %1936 = vmatprep.mubr.msk.f32.mxu0 %vm40_vm0, %v26_v14  ;;  %v2398_v14 = vld [vmem:[%s2885_s1 + $0x10] sm:$0xff] }
  0x1e   :  { %1937 = vmatmul.mubr.msk.f32.gmra.mxu0 %vm40_vm0, %v27_v15 }
  0xca   :  { %v119_v18 = vpop.f32.mrf.mxu0 }
  0xcb   :  { %v243_v19 = vmul.f32 %v227_v17, %v119_v18  ;;  %v244_v24 = vmul.f32 %v228_v21, %v119_v18  ;;  %v245_v27 = vmul.f32 %v229_v22, %v119_v18  ;;  %v246_v31 = vmul.f32 %v230_v28, %v119_v18 }
  0xcc   :  { %v121_v20 = vpop.f32.mrf.mxu0  ;;  %v247_v33 = vmul.f32 %v231_v29, %v119_v18  ;;  %v248_v39 = vmul.f32 %v232_v34, %v119_v18  ;;  %v249_v41 = vmul.f32 %v233_v37, %v119_v18  ;;  %v250_v46 = vmul.f32 %v234_v42, %v119_v18 }
  0xcd   :  { %1939 = vmatprep.subr.mxu1 %v121_v20  ;;  %1941 = vmatprep.mubr.f32.mxu1 %v243_v19 }
  0xce   :  { %v125_v23 = vpop.f32.mrf.mxu0  ;;  %1940 = vmatpush3.xpose.msra.mxu1 %v121_v20 }
  0xcf   :  { %v251_v25 = vmul.f32 %v227_v17, %v125_v23  ;;  %v252_v32 = vmul.f32 %v228_v21, %v125_v23  ;;  %v253_v36 = vmul.f32 %v229_v22, %v125_v23  ;;  %v254_v40 = vmul.f32 %v230_v28, %v125_v23 }
  0xd0   :  { %v127_v26 = vpop.f32.mrf.mxu0  ;;  %v255_v44 = vmul.f32 %v231_v29, %v125_v23  ;;  %v256_v47 = vmul.f32 %v232_v34, %v125_v23  ;;  %v257_v48 = vmul.f32 %v233_v37, %v125_v23  ;;  %v258_v52 = vmul.f32 %v234_v42, %v125_v23 }
  0xd1   :  { %1942 = vmatmul.mubr.f32.vlgmr.msra.gmra.mxu1 %v244_v24  ;;  %1953 = vmatprep.subr.mxu0 %v127_v26 }
  0xd2   :  { %1955 = vmatprep.mubr.f32.mxu0 %v251_v25  ;;  %1944 = vmatprep.mubr.f32.mxu1 %v245_v27  ;;  %v131_v30 = vpop.f32.mrf.mxu0 }
  0xd3   :  { %1954 = vmatpush3.xpose.msra.mxu0 %v127_v26  ;;  %v259_v45 = vmul.f32 %v227_v17, %v131_v30  ;;  %v260_v49 = vmul.f32 %v228_v21, %v131_v30  ;;  %v261_v50 = vmul.f32 %v229_v22, %v131_v30  ;;  %v262_v53 = vmul.f32 %v230_v28, %v131_v30 }
  0xd4   :  { %v133_v35 = vpop.f32.mrf.mxu0  ;;  %v263_v55 = vmul.f32 %v231_v29, %v131_v30  ;;  %v264_v57 = vmul.f32 %v232_v34, %v131_v30  ;;  %v265_v59 = vmul.f32 %v233_v37, %v131_v30  ;;  %v266_v61 = vmul.f32 %v234_v42, %v131_v30 }
  0xd5   :  { %1945 = vmatmul.mubr.f32.gmra.mxu1 %v246_v31  ;;  %1967 = vmatprep.subr.mxu1 %v133_v35  ;;  %v2419_v31 = vld [vmem:[%s2885_s1 + $0x20] sm:$0xff] }
  0xd6   :  { %1956 = vmatmul.mubr.f32.vlgmr.msra.gmra.mxu0 %v252_v32  ;;  %1947 = vmatprep.mubr.f32.mxu1 %v247_v33  ;;  %v137_v38 = vpop.f32.mrf.mxu0 }
  0xd7   :  { %1958 = vmatprep.mubr.f32.mxu0 %v253_v36  ;;  %1968 = vmatpush3.xpose.msra.mxu1 %v133_v35  ;;  %v267_v51 = vmul.f32 %v227_v17, %v137_v38  ;;  %v268_v54 = vmul.f32 %v228_v21, %v137_v38  ;;  %v269_v56 = vmul.f32 %v229_v22, %v137_v38 }
  0xd8   :  { %v139_v43 = vpop.f32.mrf.mxu0  ;;  %v270_v58 = vmul.f32 %v230_v28, %v137_v38  ;;  %v271_v60 = vmul.f32 %v231_v29, %v137_v38  ;;  %v272_v62 = vmul.f32 %v232_v34, %v137_v38  ;;  %v273_v63 = vmul.f32 %v233_v37, %v137_v38 }
  0xd9   :  { %1948 = vmatmul.mubr.f32.gmra.mxu1 %v248_v39  ;;  %1981 = vmatprep.subr.mxu0 %v139_v43  ;;  %v274_v0 = vmul.f32 %v234_v42, %v137_v38 }
  0xda   :  { %1959 = vmatmul.mubr.f32.gmra.mxu0 %v254_v40  ;;  %1950 = vmatprep.mubr.f32.mxu1 %v249_v41  ;;  %v1935_v1 = vpop.f32.mrf.mxu0 }
  0xdb   :  { %1961 = vmatprep.mubr.f32.mxu0 %v255_v44  ;;  %1982 = vmatpush3.xpose.msra.mxu0 %v139_v43  ;;  %v2437_v43 = vld [vmem:[%s2885_s1 + $0x28] sm:$0xff] }
  0xdc   :  { %2009 = vmatprep.subr.mxu0 %v1935_v1  ;;  %v208_v2 = vpop.f32.mrf.mxu0 }
  0xdd   :  { %1951 = vmatmul.mubr.f32.gmra.mxu1 %v250_v46  ;;  %1995 = vmatprep.subr.mxu1 %v208_v2 }
  0xde   :  { %1962 = vmatmul.mubr.f32.gmra.mxu0 %v256_v47  ;;  %1969 = vmatprep.mubr.f32.mxu1 %v259_v45  ;;  %v2370_v3 = vpop.f32.mrf.mxu0 }
  0xdf   :  { %1964 = vmatprep.mubr.f32.mxu0 %v257_v48 }
  0xe0   :  { %v2373_v4 = vpop.f32.mrf.mxu0 }
  0xe1   :  { %1970 = vmatmul.mubr.f32.vlgmr.msra.gmra.mxu1 %v260_v49 }
  0xe2   :  { %1965 = vmatmul.mubr.f32.gmra.mxu0 %v258_v52  ;;  %1972 = vmatprep.mubr.f32.mxu1 %v261_v50 }
  0xe3   :  { %1983 = vmatprep.mubr.f32.mxu0 %v267_v51  ;;  %1996 = vmatpush3.msra.mxu1 %v208_v2  ;;  %v2450_v51 = vld [vmem:[%s2885_s1 + $0x30] sm:$0xff] }
  0xe4   :  { %2023 = vmatprep.subr.mxu1 %v2373_v4 }
  0xe5   :  { %1973 = vmatmul.mubr.f32.gmra.mxu1 %v262_v53 }
  0xe6   :  { %1984 = vmatmul.mubr.f32.vlgmr.msra.gmra.mxu0 %v268_v54  ;;  %1975 = vmatprep.mubr.f32.mxu1 %v263_v55 }
  0xe7   :  { %1986 = vmatprep.mubr.f32.mxu0 %v269_v56  ;;  %2010 = vmatpush3.msra.mxu0 %v1935_v1 }
  0xe8   :  { %2037 = vmatprep.subr.mxu0 %v2370_v3 }
  0xe9   :  { %1976 = vmatmul.mubr.f32.gmra.mxu1 %v264_v57 }
  0xea   :  { %1987 = vmatmul.mubr.f32.gmra.mxu0 %v270_v58  ;;  %1978 = vmatprep.mubr.f32.mxu1 %v265_v59 }
  0xeb   :  { %1989 = vmatprep.mubr.f32.mxu0 %v271_v60 }
  0xed   :  { %1979 = vmatmul.mubr.f32.gmra.mxu1 %v266_v61 }
  0xee   :  { %1990 = vmatmul.mubr.f32.gmra.mxu0 %v272_v62  ;;  %v2467_v62 = vld [vmem:[%s2885_s1 + $0x38] sm:$0xff] }
  0xef   :  { %1992 = vmatprep.mubr.f32.mxu0 %v273_v63 }
  0xf2   :  { %1993 = vmatmul.mubr.f32.gmra.mxu0 %v274_v0 }
 0x191   :  { %v1943_v6 = vpop.f32.mrf.mxu1 }
 0x192   :  { %v347_v8 = vadd.f32 %v1943_v6, %v2379_v5 }
 0x193   :  { %v341_v9 = vpop.f32.mrf.mxu1 }
 0x194   :  { %v2387_v10 = vmul.f32 0.25, %v347_v8  ;;  %v342_v11 = vadd.f32 %v341_v9, %v2384_v7 }
 0x195   :  { %v1946_v13 = vpop.f32.mrf.mxu1 }
 0x196   :  { %v2400_v15 = vmul.f32 0.25, %v342_v11  ;;  %v1957_v16 = vpop.f32.mrf.mxu0  ;;  %v731_v17 = vsel %vm727_vm1, %v2387_v10, -inf  ;;  %v357_v18 = vadd.f32 %v1946_v13, %v2393_v12 }
 0x197   :  { %v452_v19 = vadd.f32 %v1957_v16, %v2379_v5  ;;  %732 = vmax.xlane.f32.xlu0 %v731_v17  ;;  %v351_v20 = vpop.f32.mrf.mxu1 }
 0x198   :  { %v352_v21 = vadd.f32 %v351_v20, %v2398_v14  ;;  %v446_v22 = vpop.f32.mrf.mxu0  ;;  %v728_v27 = vsel %vm727_vm1, %v2400_v15, -inf  ;;  %v2413_v28 = vmul.f32 0.25, %v357_v18 }
 0x199   :  { %v2407_v23 = vmul.f32 0.25, %v452_v19  ;;  %v1949_v24 = vpop.f32.mrf.mxu1  ;;  %v447_v29 = vadd.f32 %v446_v22, %v2384_v7 }
 0x19a   :  { %v2409_v25 = vmul.f32 0.25, %v352_v21  ;;  %v1960_v26 = vpop.f32.mrf.mxu0  ;;  %v737_v42 = vsel %vm727_vm1, %v2413_v28, -inf  ;;  %v367_v48 = vadd.f32 %v1949_v24, %v2437_v43 }
 0x19b   :  { %v361_v30 = vpop.f32.mrf.mxu1  ;;  %729 = vmax.xlane.f32.xlu0 %v728_v27  ;;  %v755_v32 = vsel %vm727_vm1, %v2407_v23, -inf  ;;  %v2427_v38 = vmul.f32 0.25, %v447_v29  ;;  %v462_v39 = vadd.f32 %v1960_v26, %v2393_v12 }
 0x19c   :  { %756 = vmax.xlane.f32.xlu1 %v755_v32  ;;  %v456_v33 = vpop.f32.mrf.mxu0  ;;  %v362_v35 = vadd.f32 %v361_v30, %v2419_v31  ;;  %v734_v37 = vsel %vm727_vm1, %v2409_v25, -inf  ;;  %v2459_v57 = vmul.f32 0.25, %v367_v48 }
 0x19d   :  { %v457_v34 = vadd.f32 %v456_v33, %v2398_v14  ;;  %v1952_v41 = vpop.f32.mrf.mxu1  ;;  %v2445_v49 = vmul.f32 0.25, %v462_v39  ;;  %v752_v53 = vsel %vm727_vm1, %v2427_v38, -inf }
 0x19e   :  { %v1963_v36 = vpop.f32.mrf.mxu0  ;;  %v2439_v45 = vmul.f32 0.25, %v362_v35  ;;  %v377_v2 = vadd.f32 %v1952_v41, %v2467_v62  ;;  %v743_v11 = vsel %vm727_vm1, %v2459_v57, -inf }
 0x19f   :  { %v2430_v40 = vmul.f32 0.25, %v457_v34  ;;  %735 = vmax.xlane.f32.xlu0 %v734_v37  ;;  %v371_v50 = vpop.f32.mrf.mxu1  ;;  %v472_v58 = vadd.f32 %v1963_v36, %v2437_v43  ;;  %v761_v61 = vsel %vm727_vm1, %v2445_v49, -inf }
 0x1a0   :  { %738 = vmax.xlane.f32.xlu1 %v737_v42  ;;  %v466_v44 = vpop.f32.mrf.mxu0  ;;  %v372_v54 = vadd.f32 %v371_v50, %v2450_v51  ;;  %v740_v56 = vsel %vm727_vm1, %v2439_v45, -inf  ;;  %v2484_v18 = vmul.f32 0.25, %v377_v2 }
 0x1a1   :  { %v467_v46 = vadd.f32 %v466_v44, %v2419_v31  ;;  %v758_v47 = vsel %vm727_vm1, %v2430_v40, -inf  ;;  %v1971_v59 = vpop.f32.mrf.mxu1  ;;  %v2475_v6 = vmul.f32 0.25, %v472_v58 }
 0x1a2   :  { %v1966_v52 = vpop.f32.mrf.mxu0  ;;  %v2469_v63 = vmul.f32 0.25, %v372_v54  ;;  %v557_v30 = vadd.f32 %v1971_v59, %v2379_v5  ;;  %v749_v34 = vsel %vm727_vm1, %v2484_v18, -inf }
 0x1a3   :  { %759 = vmax.xlane.f32.xlu0 %v758_v47  ;;  %v2455_v55 = vmul.f32 0.25, %v467_v46  ;;  %v551_v8 = vpop.f32.mrf.mxu1  ;;  %v482_v19 = vadd.f32 %v1966_v52, %v2467_v62  ;;  %v767_v22 = vsel %vm727_vm1, %v2475_v6, -inf }
 0x1a4   :  { %753 = vmax.xlane.f32.xlu1 %v752_v53  ;;  %v476_v60 = vpop.f32.mrf.mxu0  ;;  %v552_v13 = vadd.f32 %v551_v8, %v2384_v7  ;;  %v746_v17 = vsel %vm727_vm1, %v2469_v63, -inf  ;;  %v2504_v37 = vmul.f32 0.25, %v557_v30 }
 0x1a5   :  { %v477_v0 = vadd.f32 %v476_v60, %v2450_v51  ;;  %v764_v1 = vsel %vm727_vm1, %v2455_v55, -inf  ;;  %v1974_v20 = vpop.f32.mrf.mxu1  ;;  %v2494_v29 = vmul.f32 0.25, %v482_v19 }
 0x1a6   :  { %v1985_v9 = vpop.f32.mrf.mxu0  ;;  %v2489_v24 = vmul.f32 0.25, %v552_v13  ;;  %v567_v50 = vadd.f32 %v1974_v20, %v2393_v12  ;;  %v779_v54 = vsel %vm727_vm1, %v2504_v37, -inf }
 0x1a7   :  { %741 = vmax.xlane.f32.xlu0 %v740_v56  ;;  %v2480_v16 = vmul.f32 0.25, %v477_v0  ;;  %v561_v32 = vpop.f32.mrf.mxu1  ;;  %v662_v39 = vadd.f32 %v1985_v9, %v2379_v5  ;;  %v773_v44 = vsel %vm727_vm1, %v2494_v29, -inf }
 0x1a8   :  { %762 = vmax.xlane.f32.xlu1 %v761_v61  ;;  %v656_v21 = vpop.f32.mrf.mxu0  ;;  %v562_v36 = vadd.f32 %v561_v32, %v2398_v14  ;;  %v2524_v60 = vmul.f32 0.25, %v567_v50 }
 0x1a9   :  { %v657_v26 = vadd.f32 %v656_v21, %v2384_v7  ;;  %v770_v27 = vsel %vm727_vm1, %v2480_v16, -inf  ;;  %v776_v7 = vsel %vm727_vm1, %v2489_v24, -inf  ;;  %v1977_v41 = vpop.f32.mrf.mxu1  ;;  %v2515_v52 = vmul.f32 0.25, %v662_v39 }
 0x1aa   :  { %v1988_v33 = vpop.f32.mrf.mxu0  ;;  %v2511_v47 = vmul.f32 0.25, %v562_v36  ;;  %v785_v19 = vsel %vm727_vm1, %v2524_v60, -inf }
 0x1ab   :  { %765 = vmax.xlane.f32.xlu0 %v764_v1  ;;  %v2499_v35 = vmul.f32 0.25, %v657_v26  ;;  %v571_v53 = vpop.f32.mrf.mxu1  ;;  %v803_v1 = vsel %vm727_vm1, %v2515_v52, -inf }
 0x1ac   :  { %744 = vmax.xlane.f32.xlu1 %v743_v11  ;;  %v666_v42 = vpop.f32.mrf.mxu0  ;;  %v572_v56 = vadd.f32 %v571_v53, %v2419_v31  ;;  %v782_v59 = vsel %vm727_vm1, %v2511_v47, -inf  ;;  %v577_v11 = vadd.f32 %v1977_v41, %v2437_v43 }
 0x1ad   :  { %v800_v46 = vsel %vm727_vm1, %v2499_v35, -inf  ;;  %v667_v48 = vadd.f32 %v666_v42, %v2398_v14  ;;  %v672_v14 = vadd.f32 %v1988_v33, %v2393_v12  ;;  %v1980_v61 = vpop.f32.mrf.mxu1 }
 0x1ae   :  { %v1991_v5 = vpop.f32.mrf.mxu0  ;;  %v2529_v2 = vmul.f32 0.25, %v572_v56 }
 0x1af   :  { %747 = vmax.xlane.f32.xlu0 %v746_v17  ;;  %v2520_v58 = vmul.f32 0.25, %v667_v48  ;;  %v2535_v13 = vmul.f32 0.25, %v672_v14  ;;  %v581_v17 = vpop.f32.mrf.mxu1  ;;  %v682_v26 = vadd.f32 %v1991_v5, %v2437_v43 }
 0x1b0   :  { %768 = vmax.xlane.f32.xlu1 %v767_v22  ;;  %v676_v0 = vpop.f32.mrf.mxu0  ;;  %v582_v20 = vadd.f32 %v581_v17, %v2450_v51  ;;  %v2544_v22 = vmul.f32 0.25, %v577_v11 }
 0x1b1   :  { %v677_v8 = vadd.f32 %v676_v0, %v2419_v31  ;;  %v806_v9 = vsel %vm727_vm1, %v2520_v58, -inf  ;;  %v788_v31 = vsel %vm727_vm1, %v2529_v2, -inf  ;;  %v809_v30 = vsel %vm727_vm1, %v2535_v13, -inf }
 0x1b2   :  { %v1994_v12 = vpop.f32.mrf.mxu0  ;;  %v2549_v32 = vmul.f32 0.25, %v582_v20  ;;  %v2555_v36 = vmul.f32 0.25, %v682_v26  ;;  %v791_v43 = vsel %vm727_vm1, %v2544_v22, -inf }
 0x1b3   :  { %771 = vmax.xlane.f32.xlu0 %v770_v27  ;;  %v2540_v21 = vmul.f32 0.25, %v677_v8 }
 0x1b4   :  { %750 = vmax.xlane.f32.xlu1 %v749_v34  ;;  %v686_v27 = vpop.f32.mrf.mxu0  ;;  %v794_v41 = vsel %vm727_vm1, %v2549_v32, -inf }
 0x1b5   :  { %v687_v33 = vadd.f32 %v686_v27, %v2450_v51  ;;  %v812_v34 = vsel %vm727_vm1, %v2540_v21, -inf  ;;  %v692_v51 = vadd.f32 %v1994_v12, %v2467_v62 }
 0x1b7   :  { %777 = vmax.xlane.f32.xlu0 %v776_v7  ;;  %v587_v7 = vadd.f32 %v1980_v61, %v2467_v62  ;;  %v2559_v39 = vmul.f32 0.25, %v687_v33  ;;  %v2570_v48 = vmul.f32 0.25, %v692_v51 }
 0x1b8   :  { %774 = vmax.xlane.f32.xlu1 %v773_v44  ;;  %v815_v44 = vsel %vm727_vm1, %v2555_v36, -inf }
 0x1b9   :  { %v2563_v42 = vmul.f32 0.25, %v587_v7  ;;  %v821_v53 = vsel %vm727_vm1, %v2570_v48, -inf }
 0x1bb   :  { %801 = vmax.xlane.f32.xlu0 %v800_v46  ;;  %v818_v46 = vsel %vm727_vm1, %v2559_v39, -inf  ;;  %v797_v50 = vsel %vm727_vm1, %v2563_v42, -inf }
 0x1bc   :  { %780 = vmax.xlane.f32.xlu1 %v779_v54 }
 0x1bf   :  { %783 = vmax.xlane.f32.xlu0 %v782_v59 }
 0x1c0   :  { %804 = vmax.xlane.f32.xlu1 %v803_v1 }
 0x1c3   :  { %807 = vmax.xlane.f32.xlu0 %v806_v9 }
 0x1c4   :  { %786 = vmax.xlane.f32.xlu1 %v785_v19 }
 0x1c7   :  { %789 = vmax.xlane.f32.xlu0 %v788_v31 }
 0x1c8   :  { %810 = vmax.xlane.f32.xlu1 %v809_v30 }
 0x1cb   :  { %813 = vmax.xlane.f32.xlu0 %v812_v34 }
 0x1cc   :  { %792 = vmax.xlane.f32.xlu1 %v791_v43 }
 0x1cf   :  { %795 = vmax.xlane.f32.xlu0 %v794_v41 }
 0x1d0   :  { %816 = vmax.xlane.f32.xlu1 %v815_v44 }
 0x1d3   :  { %819 = vmax.xlane.f32.xlu0 %v818_v46 }
 0x1d4   :  { %798 = vmax.xlane.f32.xlu1 %v797_v50 }
 0x1d8   :  { %822 = vmax.xlane.f32.xlu1 %v821_v53 }
 0x220   :  { %v733_v62 = vpop.xlane.xlu0 %732 }
 0x221   :  { %v825_v5 = vsub.f32 %v2387_v10, %v733_v62 }
 0x223   :  { %v858_v54 = vmul.f32 1.442695, %v825_v5 }
 0x224   :  { %v730_v56 = vpop.xlane.xlu0 %729 }
 0x225   :  { %2093 = vpow2.f32 %v858_v54  ;;  %v824_v59 = vsub.f32 %v2400_v15, %v730_v56  ;;  %v757_v14 = vpop.xlane.xlu1 %756 }
 0x226   :  { %v833_v61 = vsub.f32 %v2407_v23, %v757_v14 }
 0x227   :  { %v856_v0 = vmul.f32 1.442695, %v824_v59 }
 0x228   :  { %v874_v1 = vmul.f32 1.442695, %v833_v61  ;;  %v736_v8 = vpop.xlane.xlu0 %735 }
 0x229   :  { %2095 = vpow2.f32 %v856_v0  ;;  %v739_v9 = vpop.xlane.xlu1 %738  ;;  %v826_v17 = vsub.f32 %v2409_v25, %v736_v8 }
 0x22a   :  { %2097 = vpow2.f32 %v874_v1  ;;  %v827_v11 = vsub.f32 %v2413_v28, %v739_v9 }
 0x22b   :  { %v860_v31 = vmul.f32 1.442695, %v826_v17 }
 0x22c   :  { %v862_v12 = vmul.f32 1.442695, %v827_v11  ;;  %v760_v10 = vpop.xlane.xlu0 %759 }
 0x22d   :  { %v754_v19 = vpop.xlane.xlu1 %753  ;;  %v834_v15 = vsub.f32 %v2430_v40, %v760_v10 }
 0x22e   :  { %2099 = vpow2.f32 %v862_v12  ;;  %v832_v20 = vsub.f32 %v2427_v38, %v754_v19 }
 0x22f   :  { %v876_v28 = vmul.f32 1.442695, %v834_v15 }
 0x230   :  { %v872_v23 = vmul.f32 1.442695, %v832_v20  ;;  %v742_v26 = vpop.xlane.xlu0 %741 }
 0x231   :  { %v763_v27 = vpop.xlane.xlu1 %762  ;;  %v828_v34 = vsub.f32 %v2439_v45, %v742_v26 }
 0x232   :  { %v2583_v30 = vpop.eup %2093  ;;  %2101 = vpow2.f32 %v872_v23  ;;  %v835_v33 = vsub.f32 %v2445_v49, %v763_v27 }
 0x233   :  { %v923_v25 = vsel %vm727_vm1, %v2583_v30, 0.0  ;;  %2103 = vpow2.f32 %v860_v31  ;;  %v864_v44 = vmul.f32 1.442695, %v828_v34 }
 0x234   :  { %v878_v7 = vmul.f32 1.442695, %v835_v33  ;;  %v766_v38 = vpop.xlane.xlu0 %765  ;;  %924 = vadd.xlane.f32.xlu1 %v923_v25 }
 0x235   :  { %v745_v40 = vpop.xlane.xlu1 %744  ;;  %v836_v46 = vsub.f32 %v2455_v55, %v766_v38 }
 0x236   :  { %v2589_v43 = vpop.eup %2095  ;;  %2105 = vpow2.f32 %v878_v7  ;;  %v829_v41 = vsub.f32 %v2459_v57, %v745_v40 }
 0x237   :  { %v2592_v51 = vpop.eup %2097  ;;  %2107 = vpow2.f32 %v876_v28  ;;  %v920_v49 = vsel %vm727_vm1, %v2589_v43, 0.0  ;;  %v880_v56 = vmul.f32 1.442695, %v836_v46 }
 0x238   :  { %v866_v50 = vmul.f32 1.442695, %v829_v41  ;;  %921 = vadd.xlane.f32.xlu0 %v920_v49  ;;  %v748_v45 = vpop.xlane.xlu0 %747  ;;  %v947_v53 = vsel %vm727_vm1, %v2592_v51, 0.0 }
 0x239   :  { %948 = vadd.xlane.f32.xlu1 %v947_v53  ;;  %v769_v62 = vpop.xlane.xlu1 %768  ;;  %v830_v54 = vsub.f32 %v2469_v63, %v748_v45 }
 0x23a   :  { %2109 = vpow2.f32 %v866_v50  ;;  %v837_v57 = vsub.f32 %v2475_v6, %v769_v62 }
 0x23b   :  { %v2600_v5 = vpop.eup %2099  ;;  %2111 = vpow2.f32 %v864_v44  ;;  %v868_v8 = vmul.f32 1.442695, %v830_v54 }
 0x23c   :  { %v882_v59 = vmul.f32 1.442695, %v837_v57  ;;  %v772_v14 = vpop.xlane.xlu0 %771  ;;  %v929_v55 = vsel %vm727_vm1, %v2600_v5, 0.0 }
 0x23d   :  { %930 = vadd.xlane.f32.xlu1 %v929_v55  ;;  %v751_v61 = vpop.xlane.xlu1 %750  ;;  %v838_v6 = vsub.f32 %v2480_v16, %v772_v14 }
 0x23e   :  { %2113 = vpow2.f32 %v882_v59  ;;  %v831_v0 = vsub.f32 %v2484_v18, %v751_v61 }
 0x23f   :  { %v2606_v1 = vpop.eup %2101  ;;  %2115 = vpow2.f32 %v880_v56  ;;  %v884_v18 = vmul.f32 1.442695, %v838_v6 }
 0x240   :  { %v870_v9 = vmul.f32 1.442695, %v831_v0  ;;  %v778_v63 = vpop.xlane.xlu0 %777  ;;  %v944_v11 = vsel %vm727_vm1, %v2606_v1, 0.0  ;;  %v2611_v17 = vpop.eup %2103 }
 0x241   :  { %945 = vadd.xlane.f32.xlu0 %v944_v11  ;;  %v775_v12 = vpop.xlane.xlu1 %774  ;;  %v840_v20 = vsub.f32 %v2489_v24, %v778_v63  ;;  %v926_v23 = vsel %vm727_vm1, %v2611_v17, 0.0 }
 0x242   :  { %2117 = vpow2.f32 %v870_v9  ;;  %v839_v10 = vsub.f32 %v2494_v29, %v775_v12 }
 0x243   :  { %v2614_v19 = vpop.eup %2105  ;;  %2119 = vpow2.f32 %v868_v8  ;;  %v888_v24 = vmul.f32 1.442695, %v840_v20 }
 0x244   :  { %v2617_v16 = vpop.eup %2107  ;;  %v886_v15 = vmul.f32 1.442695, %v839_v10  ;;  %v802_v31 = vpop.xlane.xlu0 %801  ;;  %v953_v26 = vsel %vm727_vm1, %v2614_v19, 0.0 }
 0x245   :  { %927 = vadd.xlane.f32.xlu0 %v926_v23  ;;  %954 = vadd.xlane.f32.xlu1 %v953_v26  ;;  %v781_v27 = vpop.xlane.xlu1 %780  ;;  %v848_v28 = vsub.f32 %v2499_v35, %v802_v31  ;;  %v950_v7 = vsel %vm727_vm1, %v2617_v16, 0.0 }
 0x246   :  { %2121 = vpow2.f32 %v886_v15  ;;  %v841_v29 = vsub.f32 %v2504_v37, %v781_v27 }
 0x247   :  { %v2624_v33 = vpop.eup %2109  ;;  %2123 = vpow2.f32 %v884_v18  ;;  %v904_v35 = vmul.f32 1.442695, %v848_v28 }
 0x248   :  { %v890_v25 = vmul.f32 1.442695, %v841_v29  ;;  %v784_v34 = vpop.xlane.xlu0 %783  ;;  %v935_v38 = vsel %vm727_vm1, %v2624_v33, 0.0  ;;  %v2631_v40 = vpop.eup %2111 }
 0x249   :  { %951 = vadd.xlane.f32.xlu0 %v950_v7  ;;  %936 = vadd.xlane.f32.xlu1 %v935_v38  ;;  %v805_v41 = vpop.xlane.xlu1 %804  ;;  %v842_v44 = vsub.f32 %v2511_v47, %v784_v34  ;;  %v932_v45 = vsel %vm727_vm1, %v2631_v40, 0.0 }
 0x24a   :  { %2125 = vpow2.f32 %v890_v25  ;;  %v849_v37 = vsub.f32 %v2515_v52, %v805_v41 }
 0x24b   :  { %v2634_v49 = vpop.eup %2113  ;;  %2127 = vpow2.f32 %v888_v24  ;;  %v892_v47 = vmul.f32 1.442695, %v842_v44 }
 0x24c   :  { %v906_v46 = vmul.f32 1.442695, %v849_v37  ;;  %v808_v50 = vpop.xlane.xlu0 %807  ;;  %v959_v53 = vsel %vm727_vm1, %v2634_v49, 0.0  ;;  %v2641_v62 = vpop.eup %2115 }
 0x24d   :  { %933 = vadd.xlane.f32.xlu0 %v932_v45  ;;  %960 = vadd.xlane.f32.xlu1 %v959_v53  ;;  %v787_v57 = vpop.xlane.xlu1 %786  ;;  %v850_v59 = vsub.f32 %v2520_v58, %v808_v50  ;;  %v956_v61 = vsel %vm727_vm1, %v2641_v62, 0.0 }
 0x24e   :  { %2129 = vpow2.f32 %v906_v46  ;;  %v843_v52 = vsub.f32 %v2524_v60, %v787_v57 }
 0x24f   :  { %v2644_v54 = vpop.eup %2117  ;;  %2131 = vpow2.f32 %v904_v35  ;;  %v908_v63 = vmul.f32 1.442695, %v850_v59 }
 0x250   :  { %v2646_v56 = vpop.eup %2119  ;;  %v894_v14 = vmul.f32 1.442695, %v843_v52  ;;  %v790_v55 = vpop.xlane.xlu0 %789  ;;  %v941_v0 = vsel %vm727_vm1, %v2644_v54, 0.0 }
 0x251   :  { %957 = vadd.xlane.f32.xlu0 %v956_v61  ;;  %942 = vadd.xlane.f32.xlu1 %v941_v0  ;;  %v811_v8 = vpop.xlane.xlu1 %810  ;;  %v938_v58 = vsel %vm727_vm1, %v2646_v56, 0.0  ;;  %v844_v11 = vsub.f32 %v2529_v2, %v790_v55 }
 0x252   :  { %2133 = vpow2.f32 %v894_v14  ;;  %v851_v60 = vsub.f32 %v2535_v13, %v811_v8 }
 0x253   :  { %v2654_v6 = vpop.eup %2121  ;;  %2135 = vpow2.f32 %v892_v47  ;;  %v896_v2 = vmul.f32 1.442695, %v844_v11 }
 0x254   :  { %v2658_v9 = vpop.eup %2123  ;;  %v910_v12 = vmul.f32 1.442695, %v851_v60  ;;  %v814_v10 = vpop.xlane.xlu0 %813  ;;  %v965_v18 = vsel %vm727_vm1, %v2654_v6, 0.0 }
 0x255   :  { %939 = vadd.xlane.f32.xlu0 %v938_v58  ;;  %966 = vadd.xlane.f32.xlu1 %v965_v18  ;;  %v793_v20 = vpop.xlane.xlu1 %792  ;;  %v852_v31 = vsub.f32 %v2540_v21, %v814_v10  ;;  %v962_v23 = vsel %vm727_vm1, %v2658_v9, 0.0 }
 0x256   :  { %2137 = vpow2.f32 %v910_v12  ;;  %v845_v13 = vsub.f32 %v2544_v22, %v793_v20 }
 0x257   :  { %v2664_v15 = vpop.eup %2125  ;;  %2139 = vpow2.f32 %v908_v63  ;;  %v912_v21 = vmul.f32 1.442695, %v852_v31 }
 0x258   :  { %v2669_v26 = vpop.eup %2127  ;;  %v898_v27 = vmul.f32 1.442695, %v845_v13  ;;  %v796_v29 = vpop.xlane.xlu0 %795  ;;  %v971_v24 = vsel %vm727_vm1, %v2664_v15, 0.0 }
 0x259   :  { %963 = vadd.xlane.f32.xlu0 %v962_v23  ;;  %972 = vadd.xlane.f32.xlu1 %v971_v24  ;;  %v817_v28 = vpop.xlane.xlu1 %816  ;;  %v968_v34 = vsel %vm727_vm1, %v2669_v26, 0.0  ;;  %v846_v38 = vsub.f32 %v2549_v32, %v796_v29 }
 0x25a   :  { %2141 = vpow2.f32 %v898_v27  ;;  %v853_v22 = vsub.f32 %v2555_v36, %v817_v28 }
 0x25b   :  { %v2674_v25 = vpop.eup %2129  ;;  %2143 = vpow2.f32 %v896_v2  ;;  %v900_v32 = vmul.f32 1.442695, %v846_v38 }
 0x25c   :  { %v2678_v7 = vpop.eup %2131  ;;  %v914_v41 = vmul.f32 1.442695, %v853_v22  ;;  %v995_v37 = vsel %vm727_vm1, %v2674_v25, 0.0  ;;  %v820_v35 = vpop.xlane.xlu0 %819 }
 0x25d   :  { %969 = vadd.xlane.f32.xlu0 %v968_v34  ;;  %996 = vadd.xlane.f32.xlu1 %v995_v37  ;;  %v799_v44 = vpop.xlane.xlu1 %798  ;;  %v992_v50 = vsel %vm727_vm1, %v2678_v7, 0.0  ;;  %v854_v53 = vsub.f32 %v2559_v39, %v820_v35 }
 0x25e   :  { %2145 = vpow2.f32 %v914_v41  ;;  %v847_v36 = vsub.f32 %v2563_v42, %v799_v44 }
 0x25f   :  { %v2684_v46 = vpop.eup %2133  ;;  %2147 = vpow2.f32 %v912_v21  ;;  %v916_v55 = vmul.f32 1.442695, %v854_v53 }
 0x260   :  { %v2688_v45 = vpop.eup %2135  ;;  %v902_v57 = vmul.f32 1.442695, %v847_v36  ;;  %v977_v52 = vsel %vm727_vm1, %v2684_v46, 0.0 }
 0x261   :  { %993 = vadd.xlane.f32.xlu0 %v992_v50  ;;  %978 = vadd.xlane.f32.xlu1 %v977_v52  ;;  %v823_v47 = vpop.xlane.xlu1 %822  ;;  %v974_v14 = vsel %vm727_vm1, %v2688_v45, 0.0 }
 0x262   :  { %2149 = vpow2.f32 %v902_v57  ;;  %v855_v42 = vsub.f32 %v2570_v48, %v823_v47 }
 0x263   :  { %v2694_v59 = vpop.eup %2137  ;;  %2151 = vpow2.f32 %v900_v32 }
 0x264   :  { %v918_v61 = vmul.f32 1.442695, %v855_v42  ;;  %v1001_v39 = vsel %vm727_vm1, %v2694_v59, 0.0  ;;  %v2700_v0 = vpop.eup %2139 }
 0x265   :  { %975 = vadd.xlane.f32.xlu0 %v974_v14  ;;  %1002 = vadd.xlane.f32.xlu1 %v1001_v39  ;;  %v998_v48 = vsel %vm727_vm1, %v2700_v0, 0.0 }
 0x266   :  { %2153 = vpow2.f32 %v918_v61 }
 0x267   :  { %v2702_v8 = vpop.eup %2141  ;;  %2155 = vpow2.f32 %v916_v55 }
 0x268   :  { %v983_v60 = vsel %vm727_vm1, %v2702_v8, 0.0  ;;  %v2708_v58 = vpop.eup %2143 }
 0x269   :  { %999 = vadd.xlane.f32.xlu0 %v998_v48  ;;  %984 = vadd.xlane.f32.xlu1 %v983_v60  ;;  %v980_v12 = vsel %vm727_vm1, %v2708_v58, 0.0 }
 0x26b   :  { %v2710_v63 = vpop.eup %2145 }
 0x26c   :  { %v2712_v11 = vpop.eup %2147  ;;  %v1007_v10 = vsel %vm727_vm1, %v2710_v63, 0.0 }
 0x26d   :  { %981 = vadd.xlane.f32.xlu0 %v980_v12  ;;  %1008 = vadd.xlane.f32.xlu1 %v1007_v10  ;;  %v1004_v20 = vsel %vm727_vm1, %v2712_v11, 0.0 }
 0x26f   :  { %v2718_v18 = vpop.eup %2149 }
 0x270   :  { %v989_v13 = vsel %vm727_vm1, %v2718_v18, 0.0  ;;  %v2724_v31 = vpop.eup %2151 }
 0x271   :  { %1005 = vadd.xlane.f32.xlu0 %v1004_v20  ;;  %990 = vadd.xlane.f32.xlu1 %v989_v13  ;;  %v986_v2 = vsel %vm727_vm1, %v2724_v31, 0.0 }
 0x273   :  { %v2726_v23 = vpop.eup %2153 }
 0x274   :  { %v1013_v27 = vsel %vm727_vm1, %v2726_v23, 0.0  ;;  %v2732_v29 = vpop.eup %2155 }
 0x275   :  { %987 = vadd.xlane.f32.xlu0 %v986_v2  ;;  %1014 = vadd.xlane.f32.xlu1 %v1013_v27  ;;  %v1010_v24 = vsel %vm727_vm1, %v2732_v29, 0.0 }
 0x279   :  { %1011 = vadd.xlane.f32.xlu0 %v1010_v24 }
 0x2bd   :  { %v925_v28 = vpop.xlane.xlu1 %924 }
 0x2be   :  { %2157 = vrcp.f32 %v925_v28 }
 0x2c1   :  { %v922_v22 = vpop.xlane.xlu0 %921 }
 0x2c2   :  { %2159 = vrcp.f32 %v922_v22  ;;  %v949_v21 = vpop.xlane.xlu1 %948 }
 0x2c3   :  { %2161 = vrcp.f32 %v949_v21 }
 0x2c6   :  { %v931_v34 = vpop.xlane.xlu1 %930 }
 0x2ca   :  { %v946_v38 = vpop.xlane.xlu0 %945 }
 0x2cb   :  { %2163 = vrcp.f32 %v946_v38  ;;  %v2158_v41 = vpop.eup %2157 }
 0x2cc   :  { %2165 = vrcp.f32 %v931_v34  ;;  %v1049_v50 = vmul.f32 %v2158_v41, %v2583_v30 }
 0x2ce   :  { %v928_v37 = vpop.xlane.xlu0 %927  ;;  %v955_v35 = vpop.xlane.xlu1 %954 }
 0x2cf   :  { %v2160_v44 = vpop.eup %2159  ;;  %2167 = vrcp.f32 %v928_v37 }
 0x2d0   :  { %v1048_v36 = vmul.f32 %v2160_v44, %v2589_v43  ;;  %2169 = vrcp.f32 %v955_v35  ;;  %v2162_v47 = vpop.eup %2161 }
 0x2d1   :  { %v1057_v30 = vmul.f32 %v2162_v47, %v2592_v51 }
 0x2d2   :  { %v952_v32 = vpop.xlane.xlu0 %951  ;;  %v937_v53 = vpop.xlane.xlu1 %936  ;;  %1997 = vmatprep.mubr.msk.f32.mxu1 %vm727_vm1, %v1048_v36 }
 0x2d3   :  { %2171 = vrcp.f32 %v952_v32  ;;  %1998 = vmatmul.mubr.msk.f32.vlgmr.msra.gmra.mxu1 %vm727_vm1, %v1049_v50 }
 0x2d4   :  { %2024 = vmatpush3.msra.mxu1 %v2373_v4  ;;  %2173 = vrcp.f32 %v937_v53 }
 0x2d6   :  { %v934_v57 = vpop.xlane.xlu0 %933  ;;  %v961_v52 = vpop.xlane.xlu1 %960 }
 0x2d7   :  { %2175 = vrcp.f32 %v934_v57 }
 0x2d8   :  { %v2164_v42 = vpop.eup %2163  ;;  %2177 = vrcp.f32 %v961_v52 }
 0x2d9   :  { %v1056_v43 = vmul.f32 %v2164_v42, %v2606_v1  ;;  %v2166_v61 = vpop.eup %2165 }
 0x2da   :  { %v958_v14 = vpop.xlane.xlu0 %957  ;;  %v943_v55 = vpop.xlane.xlu1 %942  ;;  %v1051_v1 = vmul.f32 %v2166_v61, %v2600_v5 }
 0x2db   :  { %2179 = vrcp.f32 %v958_v14  ;;  %2011 = vmatprep.mubr.msk.f32.mxu0 %vm727_vm1, %v1056_v43 }
 0x2dc   :  { %v2168_v39 = vpop.eup %2167  ;;  %2012 = vmatmul.mubr.msk.f32.vlgmr.msra.gmra.mxu0 %vm727_vm1, %v1057_v30  ;;  %2181 = vrcp.f32 %v943_v55 }
 0x2dd   :  { %2038 = vmatpush3.msra.mxu0 %v2370_v3  ;;  %v1050_v4 = vmul.f32 %v2168_v39, %v2611_v17  ;;  %v2170_v51 = vpop.eup %2169 }
 0x2de   :  { %v940_v48 = vpop.xlane.xlu0 %939  ;;  %v967_v60 = vpop.xlane.xlu1 %966  ;;  %v1059_v3 = vmul.f32 %v2170_v51, %v2614_v19 }
 0x2df   :  { %2183 = vrcp.f32 %v940_v48  ;;  %2000 = vmatprep.mubr.msk.f32.mxu1 %vm727_vm1, %v1050_v4 }
 0x2e0   :  { %v2172_v12 = vpop.eup %2171  ;;  %2001 = vmatmul.mubr.msk.f32.gmra.mxu1 %vm727_vm1, %v1051_v1  ;;  %2185 = vrcp.f32 %v967_v60 }
 0x2e1   :  { %v1058_v10 = vmul.f32 %v2172_v12, %v2617_v16  ;;  %v2174_v17 = vpop.eup %2173 }
 0x2e2   :  { %v964_v20 = vpop.xlane.xlu0 %963  ;;  %v973_v13 = vpop.xlane.xlu1 %972  ;;  %v1053_v28 = vmul.f32 %v2174_v17, %v2624_v33 }
 0x2e3   :  { %2187 = vrcp.f32 %v964_v20  ;;  %2014 = vmatprep.mubr.msk.f32.mxu0 %vm727_vm1, %v1058_v10 }
 0x2e4   :  { %v2176_v2 = vpop.eup %2175  ;;  %2015 = vmatmul.mubr.msk.f32.gmra.mxu0 %vm727_vm1, %v1059_v3  ;;  %2189 = vrcp.f32 %v973_v13 }
 0x2e5   :  { %v1052_v5 = vmul.f32 %v2176_v2, %v2631_v40  ;;  %v2178_v16 = vpop.eup %2177 }
 0x2e6   :  { %v970_v27 = vpop.xlane.xlu0 %969  ;;  %v997_v24 = vpop.xlane.xlu1 %996  ;;  %v1061_v38 = vmul.f32 %v2178_v16, %v2634_v49  ;;  %v1664_v16 = vld [vmem:[%s2888_s4 + $0x40] sm:$0xff] }
 0x2e7   :  { %2191 = vrcp.f32 %v970_v27  ;;  %2003 = vmatprep.mubr.msk.f32.mxu1 %vm727_vm1, %v1052_v5  ;;  %v1667_v27 = vld [vmem:[%s2888_s4 + $0x58] sm:$0xff] }
 0x2e8   :  { %v2180_v22 = vpop.eup %2179  ;;  %2004 = vmatmul.mubr.msk.f32.gmra.mxu1 %vm727_vm1, %v1053_v28  ;;  %2193 = vrcp.f32 %v997_v24  ;;  %v1666_v24 = vld [vmem:[%s2888_s4 + $0x50] sm:$0xff]  ;;  %v1665_v28 = vld [vmem:[%s2888_s4 + $0x48] sm:$0xff] }
 0x2e9   :  { %v1060_v19 = vmul.f32 %v2180_v22, %v2641_v62  ;;  %v2182_v40 = vpop.eup %2181  ;;  %v1663_v22 = vld [vmem:[%s2888_s4 + $0x38] sm:$0xff] }
 0x2ea   :  { %v994_v21 = vpop.xlane.xlu0 %993  ;;  %v979_v34 = vpop.xlane.xlu1 %978  ;;  %v1055_v44 = vmul.f32 %v2182_v40, %v2644_v54  ;;  %v1658_v40 = vld [vmem:[%s2888_s4 + $0x10] sm:$0xff] }
 0x2eb   :  { %2195 = vrcp.f32 %v994_v21  ;;  %2017 = vmatprep.mubr.msk.f32.mxu0 %vm727_vm1, %v1060_v19  ;;  %v1662_v19 = vld [vmem:[%s2888_s4 + $0x30] sm:$0xff]  ;;  %v1661_v21 = vld [vmem:[%s2888_s4 + $0x28] sm:$0xff] }
 0x2ec   :  { %v2184_v41 = vpop.eup %2183  ;;  %2018 = vmatmul.mubr.msk.f32.gmra.mxu0 %vm727_vm1, %v1061_v38  ;;  %2197 = vrcp.f32 %v979_v34  ;;  %v1660_v34 = vld [vmem:[%s2888_s4 + $0x20] sm:$0xff]  ;;  %v1659_v38 = vld [vmem:[%s2888_s4 + $0x18] sm:$0xff] }
 0x2ed   :  { %v1054_v33 = vmul.f32 %v2184_v41, %v2646_v56  ;;  %v2186_v62 = vpop.eup %2185  ;;  %v1657_v41 = vld [vmem:[%s2888_s4 + $0x8] sm:$0xff] }
 0x2ee   :  { %v976_v37 = vpop.xlane.xlu0 %975  ;;  %v1003_v35 = vpop.xlane.xlu1 %1002  ;;  %v1063_v53 = vmul.f32 %v2186_v62, %v2654_v6 }
 0x2ef   :  { %2199 = vrcp.f32 %v976_v37  ;;  %2006 = vmatprep.mubr.msk.f32.mxu1 %vm727_vm1, %v1054_v33  ;;  %v1656_v33 = vld [vmem:[%s2888_s4] sm:$0xff] }
 0x2f0   :  { %v2188_v36 = vpop.eup %2187  ;;  %2007 = vmatmul.mubr.msk.f32.gmra.mxu1 %vm727_vm1, %v1055_v44  ;;  %2201 = vrcp.f32 %v1003_v35 }
 0x2f1   :  { %v1062_v49 = vmul.f32 %v2188_v36, %v2658_v9  ;;  %v2190_v56 = vpop.eup %2189 }
 0x2f2   :  { %v1000_v50 = vpop.xlane.xlu0 %999  ;;  %v985_v32 = vpop.xlane.xlu1 %984  ;;  %v1065_v52 = vmul.f32 %v2190_v56, %v2664_v15  ;;  %v2222_v56 = vld [vmem:[%s2884_s0 + $0x8] sm:$0xff] }
 0x2f3   :  { %2203 = vrcp.f32 %v1000_v50  ;;  %2020 = vmatprep.mubr.msk.f32.mxu0 %vm727_vm1, %v1062_v49  ;;  %v2221_v50 = vld [vmem:[%s2884_s0] sm:$0xff] }
 0x2f4   :  { %v2192_v57 = vpop.eup %2191  ;;  %2021 = vmatmul.mubr.msk.f32.gmra.mxu0 %vm727_vm1, %v1063_v53  ;;  %2205 = vrcp.f32 %v985_v32 }
 0x2f5   :  { %v1064_v54 = vmul.f32 %v2192_v57, %v2669_v26  ;;  %v2194_v9 = vpop.eup %2193 }
 0x2f6   :  { %v982_v47 = vpop.xlane.xlu0 %981  ;;  %v1009_v42 = vpop.xlane.xlu1 %1008  ;;  %v1073_v30 = vmul.f32 %v2194_v9, %v2674_v25 }
 0x2f7   :  { %2207 = vrcp.f32 %v982_v47  ;;  %2025 = vmatprep.mubr.msk.f32.mxu1 %vm727_vm1, %v1064_v54  ;;  %v2223_v54 = vld [vmem:[%s2884_s0 + $0x10] sm:$0xff] }
 0x2f8   :  { %v2196_v43 = vpop.eup %2195  ;;  %2026 = vmatmul.mubr.msk.f32.vlgmr.msra.gmra.mxu1 %vm727_vm1, %v1065_v52  ;;  %2209 = vrcp.f32 %v1009_v42 }
 0x2f9   :  { %v1072_v6 = vmul.f32 %v2196_v43, %v2678_v7  ;;  %v2198_v26 = vpop.eup %2197 }
 0x2fa   :  { %v1006_v14 = vpop.xlane.xlu0 %1005  ;;  %v991_v55 = vpop.xlane.xlu1 %990  ;;  %v1067_v4 = vmul.f32 %v2198_v26, %v2684_v46 }
 0x2fb   :  { %2211 = vrcp.f32 %v1006_v14  ;;  %2039 = vmatprep.mubr.msk.f32.mxu0 %vm727_vm1, %v1072_v6 }
 0x2fc   :  { %v2200_v15 = vpop.eup %2199  ;;  %2040 = vmatmul.mubr.msk.f32.vlgmr.msra.gmra.mxu0 %vm727_vm1, %v1073_v30  ;;  %2213 = vrcp.f32 %v991_v55 }
 0x2fd   :  { %v1066_v61 = vmul.f32 %v2200_v15, %v2688_v45  ;;  %v2202_v48 = vpop.eup %2201  ;;  %v2224_v15 = vld [vmem:[%s2884_s0 + $0x18] sm:$0xff] }
 0x2fe   :  { %v988_v39 = vpop.xlane.xlu0 %987  ;;  %v1015_v7 = vpop.xlane.xlu1 %1014  ;;  %v1075_v51 = vmul.f32 %v2202_v48, %v2694_v59 }
 0x2ff   :  { %2215 = vrcp.f32 %v988_v39  ;;  %2028 = vmatprep.mubr.msk.f32.mxu1 %vm727_vm1, %v1066_v61  ;;  %v2225_v39 = vld [vmem:[%s2884_s0 + $0x20] sm:$0xff] }
 0x300   :  { %v2204_v25 = vpop.eup %2203  ;;  %2029 = vmatmul.mubr.msk.f32.gmra.mxu1 %vm727_vm1, %v1067_v4  ;;  %2217 = vrcp.f32 %v1015_v7 }
 0x301   :  { %v1074_v60 = vmul.f32 %v2204_v25, %v2700_v0  ;;  %v2206_v12 = vpop.eup %2205 }
 0x302   :  { %v1012_v1 = vpop.xlane.xlu0 %1011  ;;  %v1069_v10 = vmul.f32 %v2206_v12, %v2702_v8 }
 0x303   :  { %2219 = vrcp.f32 %v1012_v1  ;;  %2042 = vmatprep.mubr.msk.f32.mxu0 %vm727_vm1, %v1074_v60 }
 0x304   :  { %v2208_v45 = vpop.eup %2207  ;;  %2043 = vmatmul.mubr.msk.f32.gmra.mxu0 %vm727_vm1, %v1075_v51 }
 0x305   :  { %v1068_v46 = vmul.f32 %v2208_v45, %v2708_v58  ;;  %v2210_v20 = vpop.eup %2209 }
 0x306   :  { %v1077_v59 = vmul.f32 %v2210_v20, %v2710_v63 }
 0x307   :  { %2031 = vmatprep.mubr.msk.f32.mxu1 %vm727_vm1, %v1068_v46  ;;  %v2226_v46 = vld [vmem:[%s2884_s0 + $0x28] sm:$0xff] }
 0x308   :  { %v2212_v13 = vpop.eup %2211  ;;  %2032 = vmatmul.mubr.msk.f32.gmra.mxu1 %vm727_vm1, %v1069_v10 }
 0x309   :  { %v1076_v0 = vmul.f32 %v2212_v13, %v2712_v11  ;;  %v2214_v3 = vpop.eup %2213 }
 0x30a   :  { %v1071_v8 = vmul.f32 %v2214_v3, %v2718_v18  ;;  %v1670_v18 = vld [vmem:[%s2888_s4 + $0x70] sm:$0xff] }
 0x30b   :  { %2045 = vmatprep.mubr.msk.f32.mxu0 %vm727_vm1, %v1076_v0 }
 0x30c   :  { %v2216_v17 = vpop.eup %2215  ;;  %2046 = vmatmul.mubr.msk.f32.gmra.mxu0 %vm727_vm1, %v1077_v59  ;;  %v2227_v59 = vld [vmem:[%s2884_s0 + $0x30] sm:$0xff] }
 0x30d   :  { %v1070_v58 = vmul.f32 %v2216_v17, %v2724_v31  ;;  %v2218_v2 = vpop.eup %2217  ;;  %v1671_v31 = vld [vmem:[%s2888_s4 + $0x78] sm:$0xff] }
 0x30e   :  { %v1079_v63 = vmul.f32 %v2218_v2, %v2726_v23  ;;  %2051 = vmatprep.subr.mxu1 %v1671_v31  ;;  %v1669_v23 = vld [vmem:[%s2888_s4 + $0x68] sm:$0xff]  ;;  %v2228_v2 = vld [vmem:[%s2884_s0 + $0x38] sm:$0xff] }
 0x30f   :  { %2034 = vmatprep.mubr.msk.f32.mxu1 %vm727_vm1, %v1070_v58  ;;  %2052 = vmatpush3.msra.mxu1 %v1671_v31 }
 0x310   :  { %v2220_v5 = vpop.eup %2219  ;;  %2035 = vmatmul.mubr.msk.f32.gmra.mxu1 %vm727_vm1, %v1071_v8  ;;  %2053 = vmatprep.subr.mxu1 %v1670_v18 }
 0x311   :  { %v1078_v11 = vmul.f32 %v2220_v5, %v2732_v29  ;;  %2054 = vmatpush3.msra.mxu1 %v1670_v18  ;;  %v1668_v29 = vld [vmem:[%s2888_s4 + $0x60] sm:$0xff] }
 0x312   :  { %2055 = vmatprep.subr.mxu1 %v1669_v23 }
 0x313   :  { %2048 = vmatprep.mubr.msk.f32.mxu0 %vm727_vm1, %v1078_v11  ;;  %2056 = vmatpush3.msra.mxu1 %v1669_v23 }
 0x314   :  { %2049 = vmatmul.mubr.msk.f32.gmra.mxu0 %vm727_vm1, %v1079_v63  ;;  %2057 = vmatprep.subr.mxu1 %v1668_v29 }
 0x315   :  { %2058 = vmatpush3.msra.mxu1 %v1668_v29 }
 0x316   :  { %2059 = vmatprep.subr.mxu1 %v1667_v27 }
 0x317   :  { %2060 = vmatpush3.msra.mxu1 %v1667_v27 }
 0x318   :  { %2061 = vmatprep.subr.mxu1 %v1666_v24 }
 0x319   :  { %2062 = vmatpush3.msra.mxu1 %v1666_v24 }
 0x31a   :  { %2063 = vmatprep.subr.mxu1 %v1665_v28 }
 0x31b   :  { %2064 = vmatpush3.msra.mxu1 %v1665_v28 }
 0x31c   :  { %2065 = vmatprep.subr.mxu1 %v1664_v16 }
 0x31d   :  { %2066 = vmatpush3.msra.mxu1 %v1664_v16 }
 0x31e   :  { %2067 = vmatprep.subr.mxu1 %v1663_v22 }
 0x31f   :  { %2068 = vmatpush3.msra.mxu1 %v1663_v22 }
 0x320   :  { %2069 = vmatprep.subr.mxu1 %v1662_v19 }
 0x321   :  { %2070 = vmatpush3.msra.mxu1 %v1662_v19 }
 0x322   :  { %2071 = vmatprep.subr.mxu1 %v1661_v21 }
 0x323   :  { %2072 = vmatpush3.msra.mxu1 %v1661_v21 }
 0x324   :  { %2073 = vmatprep.subr.mxu1 %v1660_v34 }
 0x325   :  { %2074 = vmatpush3.msra.mxu1 %v1660_v34 }
 0x326   :  { %2075 = vmatprep.subr.mxu1 %v1659_v38 }
 0x327   :  { %2076 = vmatpush3.msra.mxu1 %v1659_v38 }
 0x328   :  { %2077 = vmatprep.subr.mxu1 %v1658_v40 }
 0x329   :  { %2078 = vmatpush3.msra.mxu1 %v1658_v40 }
 0x32a   :  { %2079 = vmatprep.subr.mxu1 %v1657_v41 }
 0x32b   :  { %2080 = vmatpush3.msra.mxu1 %v1657_v41 }
 0x32c   :  { %2081 = vmatprep.subr.mxu1 %v1656_v33 }
 0x32d   :  { %2082 = vmatpush3.msra.mxu1 %v1656_v33 }
 0x393   :  { %v1999_v37 = vpop.f32.mrf.mxu1 }
 0x394   :  { %v1597_v57 = vmul.f32 %v2222_v56, %v1999_v37 }
 0x395   :  { %v1170_v35 = vpop.f32.mrf.mxu1 }
 0x396   :  { %v1596_v32 = vmul.f32 %v2221_v50, %v1170_v35 }
 0x398   :  { %v1628_v42 = vadd.f32 %v1597_v57, %v1596_v32 }
 0x39c   :  { %v2013_v44 = vpop.f32.mrf.mxu0 }
 0x39d   :  { %v1605_v6 = vmul.f32 %v2222_v56, %v2013_v44 }
 0x39e   :  { %v1299_v36 = vpop.f32.mrf.mxu0 }
 0x39f   :  { %v1604_v9 = vmul.f32 %v2221_v50, %v1299_v36 }
 0x3a0   :  { %v2002_v62 = vpop.f32.mrf.mxu1 }
 0x3a1   :  { %v1629_v26 = vadd.f32 %v1605_v6, %v1604_v9  ;;  %v1599_v61 = vmul.f32 %v2224_v15, %v2002_v62 }
 0x3a2   :  { %v1180_v49 = vpop.f32.mrf.mxu1 }
 0x3a3   :  { %v1598_v52 = vmul.f32 %v2223_v54, %v1180_v49 }
 0x3a4   :  { %v2016_v53 = vpop.f32.mrf.mxu0 }
 0x3a5   :  { %v1632_v30 = vadd.f32 %v1628_v42, %v1598_v52  ;;  %v1607_v1 = vmul.f32 %v2224_v15, %v2016_v53 }
 0x3a6   :  { %v1309_v47 = vpop.f32.mrf.mxu0 }
 0x3a7   :  { %v1606_v14 = vmul.f32 %v2223_v54, %v1309_v47  ;;  %v1636_v25 = vadd.f32 %v1632_v30, %v1599_v61 }
 0x3a8   :  { %v2005_v43 = vpop.f32.mrf.mxu1 }
 0x3a9   :  { %v1633_v7 = vadd.f32 %v1629_v26, %v1606_v14  ;;  %v1601_v10 = vmul.f32 %v2226_v46, %v2005_v43 }
 0x3aa   :  { %v1190_v55 = vpop.f32.mrf.mxu1 }
 0x3ab   :  { %v1600_v4 = vmul.f32 %v2225_v39, %v1190_v55  ;;  %v1637_v20 = vadd.f32 %v1633_v7, %v1607_v1 }
 0x3ac   :  { %v2019_v48 = vpop.f32.mrf.mxu0 }
 0x3ad   :  { %v1640_v51 = vadd.f32 %v1636_v25, %v1600_v4  ;;  %v1609_v8 = vmul.f32 %v2226_v46, %v2019_v48 }
 0x3ae   :  { %v1319_v60 = vpop.f32.mrf.mxu0 }
 0x3af   :  { %v1608_v12 = vmul.f32 %v2225_v39, %v1319_v60  ;;  %v1644_v17 = vadd.f32 %v1640_v51, %v1601_v10 }
 0x3b0   :  { %v2008_v45 = vpop.f32.mrf.mxu1 }
 0x3b1   :  { %v1641_v0 = vadd.f32 %v1637_v20, %v1608_v12  ;;  %v1603_v5 = vmul.f32 %v2228_v2, %v2008_v45 }
 0x3b2   :  { %v1200_v13 = vpop.f32.mrf.mxu1 }
 0x3b3   :  { %v1602_v3 = vmul.f32 %v2227_v59, %v1200_v13  ;;  %v1645_v18 = vadd.f32 %v1641_v0, %v1609_v8 }
 0x3b4   :  { %v2022_v58 = vpop.f32.mrf.mxu0 }
 0x3b5   :  { %v1648_v11 = vadd.f32 %v1644_v17, %v1602_v3  ;;  %v1611_v29 = vmul.f32 %v2228_v2, %v2022_v58 }
 0x3b6   :  { %v1329_v63 = vpop.f32.mrf.mxu0 }
 0x3b7   :  { %v1610_v31 = vmul.f32 %v2227_v59, %v1329_v63  ;;  %v1652_v23 = vadd.f32 %v1648_v11, %v1603_v5 }
 0x3b8   :  { %v2027_v24 = vpop.f32.mrf.mxu1 }
 0x3b9   :  { %v1649_v27 = vadd.f32 %v1645_v18, %v1610_v31  ;;  %2083 = vmatprep.mubr.f32.mxu1 %v1652_v23  ;;  %v1613_v41 = vmul.f32 %v2222_v56, %v2027_v24 }
 0x3ba   :  { %v1428_v16 = vpop.f32.mrf.mxu1 }
 0x3bb   :  { %v1653_v28 = vadd.f32 %v1649_v27, %v1611_v29  ;;  %v1612_v38 = vmul.f32 %v2221_v50, %v1428_v16 }
 0x3bc   :  { %v2041_v22 = vpop.f32.mrf.mxu0 }
 0x3bd   :  { %2084 = vmatmul.mubr.f32.vlgmr.msra.gmra.mxu1 %v1653_v28  ;;  %v1630_v35 = vadd.f32 %v1613_v41, %v1612_v38  ;;  %v1621_v36 = vmul.f32 %v2222_v56, %v2041_v22 }
 0x3be   :  { %v1557_v21 = vpop.f32.mrf.mxu0 }
 0x3bf   :  { %v1620_v44 = vmul.f32 %v2221_v50, %v1557_v21 }
 0x3c0   :  { %v2030_v19 = vpop.f32.mrf.mxu1 }
 0x3c1   :  { %v1631_v57 = vadd.f32 %v1621_v36, %v1620_v44  ;;  %v1615_v52 = vmul.f32 %v2224_v15, %v2030_v19 }
 0x3c2   :  { %v1438_v34 = vpop.f32.mrf.mxu1 }
 0x3c3   :  { %v1614_v33 = vmul.f32 %v2223_v54, %v1438_v34 }
 0x3c4   :  { %v2044_v40 = vpop.f32.mrf.mxu0 }
 0x3c5   :  { %v1634_v49 = vadd.f32 %v1630_v35, %v1614_v33  ;;  %v1623_v30 = vmul.f32 %v2224_v15, %v2044_v40 }
 0x3c6   :  { %v1567_v37 = vpop.f32.mrf.mxu0 }
 0x3c7   :  { %v1622_v32 = vmul.f32 %v2223_v54, %v1567_v37  ;;  %v1638_v43 = vadd.f32 %v1634_v49, %v1615_v52 }
 0x3c8   :  { %v2033_v62 = vpop.f32.mrf.mxu1 }
 0x3c9   :  { %v1635_v9 = vadd.f32 %v1631_v57, %v1622_v32  ;;  %v1617_v61 = vmul.f32 %v2226_v46, %v2033_v62 }
 0x3ca   :  { %v1448_v53 = vpop.f32.mrf.mxu1 }
 0x3cb   :  { %v1616_v47 = vmul.f32 %v2225_v39, %v1448_v53  ;;  %v1639_v4 = vadd.f32 %v1635_v9, %v1623_v30 }
 0x3cc   :  { %v2047_v42 = vpop.f32.mrf.mxu0 }
 0x3cd   :  { %v1642_v14 = vadd.f32 %v1638_v43, %v1616_v47  ;;  %v1625_v54 = vmul.f32 %v2226_v46, %v2047_v42 }
 0x3ce   :  { %v1577_v6 = vpop.f32.mrf.mxu0 }
 0x3cf   :  { %v1624_v55 = vmul.f32 %v2225_v39, %v1577_v6  ;;  %v1646_v56 = vadd.f32 %v1642_v14, %v1617_v61  ;;  %v1824_v39 = vld [vmem:[%s2889_s5] ss:$0 sm:$0xff]  ;;  %s2229_s5 = scalar_lea.vmem %s1774_s30, 512 }
 0x3d0   :  { %v2036_v26 = vpop.f32.mrf.mxu1  ;;  %p2230_p0 = scmp.ne.s32.totalorder %s1774_s30, %s2229_s5  ;;  %p2235_p2 = scmp.lt.s32.totalorder %s2229_s5, %s2229_s5 }
 0x3d1   :  { %v1643_v50 = vadd.f32 %v1639_v4, %v1624_v55  ;;  %v1619_v60 = vmul.f32 %v2228_v2, %v2036_v26 }
 0x3d2   :  { %v1458_v48 = vpop.f32.mrf.mxu1  ;;  %p2236_p3 = por %p2235_p2, %p2234_p1 }
 0x3d3   :  { %v1618_v7 = vmul.f32 %v2227_v59, %v1458_v48  ;;  %v1647_v45 = vadd.f32 %v1643_v50, %v1625_v54 }
 0x3d4   :  { %v2050_v25 = vpop.f32.mrf.mxu0  ;;  %p2237_p4 = pnand %p2236_p3, %p2230_p0 }
 0x3d5   :  { %v1650_v1 = vadd.f32 %v1646_v56, %v1618_v7  ;;  %v1627_v20 = vmul.f32 %v2228_v2, %v2050_v25 }
 0x3d6   :  { %v1587_v51 = vpop.f32.mrf.mxu0 }
 0x3d7   :  { %v1626_v12 = vmul.f32 %v2227_v59, %v1587_v51  ;;  %v1654_v10 = vadd.f32 %v1650_v1, %v1619_v60 }
 0x3d9   :  { %v1651_v13 = vadd.f32 %v1647_v45, %v1626_v12  ;;  %2086 = vmatprep.mubr.f32.mxu1 %v1654_v10 }
 0x3db   :  { %v1655_v15 = vadd.f32 %v1651_v13, %v1627_v20 }
 0x3dd   :  { %2087 = vmatmul.mubr.f32.gmra.mxu1 %v1655_v15 }
 0x47d   :  { %v2085_v0 = vpop.f32.mrf.mxu1 }
 0x47e   :  { %v1751_v3 = vadd.f32 %v2085_v0, %v1824_v39 }
 0x47f   :  { %v1745_v17 = vpop.f32.mrf.mxu1 }
 0x480   :  { %1765 = vst.msk [vmem:[#allocation2 + $0x8] sm:$0xff] %vm40_vm0, %v1751_v3  ;;  %v1746_v46 = vadd.f32 %v1824_v39, %v1745_v17 }
 0x482   :  { %1764 = vst.msk [vmem:[#allocation2] sm:$0xff] %vm40_vm0, %v1746_v46 }
 0x49d   :  { %v2088_v59 = vpop.f32.mrf.mxu1 }
 0x49e   :  { %v1761_v58 = vadd.f32 %v2088_v59, %v1824_v39 }
 0x49f   :  { %v1755_v8 = vpop.f32.mrf.mxu1 }
 0x4a0   :  { %1767 = vst.msk [vmem:[#allocation2 + $0x18] sm:$0xff] %vm40_vm0, %v1761_v58  ;;  %v1756_v2 = vadd.f32 %v1824_v39, %v1755_v8 }
 0x4a2   :  { %1766 = vst.msk [vmem:[#allocation2 + $0x10] sm:$0xff] %vm40_vm0, %v1756_v2 }
 0x4a3   :  { %2240 = shalt.err (!%p2237_p4)
}
 0x4a4   :  { %s2253_s2 = smov 128   ;;  %s2254_s7 = smov 8  }
 0x4a5   :  { %1779 = dma.vmem_to_hbm [thread:$0]  %s1774_s30, 512, %s2890_s6, [#allocation3], %s2253_s2, %s2253_s2, %s2254_s7  }
 0x4a6   :  { %2249 = dma.done.wait [#allocation3], 512  }
 0x4a7   :  { %2250 = vsyncadd [#allocation3], 4294966784 }
 0x4a8   :  { %1783 = vsyncpa [#allocation3], 1 }

</bundles_post_ra>
